<compile_context>
chip_gen: v5e
topology: v5e:2x2
jax: 0.10.0
libtpu: 0.0.40
codegen_flags: <defaults>
</compile_context>

<pallas_src>
import jax
import jax.numpy as jnp
from jax.experimental import pallas as pl
from jax.experimental.pallas import tpu as pltpu


def ca_kernel(x_ref, w1_ref, b1_ref, w2_ref, b2_ref, o_ref):
    # x_ref block: (Nb, C, HW) in the input's native dtype.
    x = x_ref[...]
    hw = x.shape[-1]

    # AdaptiveAvgPool2d(1): mean over the (flattened) spatial axis.
    # Accumulate in f32 without materializing an f32 copy of the whole tile.
    pooled = jnp.sum(x, axis=-1, dtype=jnp.float32) * jnp.float32(1.0 / hw)  # (Nb, C)

    w1 = w1_ref[...].astype(jnp.float32)   # (Cr, C)   -- lane dim = C (dense)
    w2 = w2_ref[...].astype(jnp.float32)   # (Cr, C)   -- transposed 2nd conv weight

    # Squeeze: Conv2d(C, Cr, 1) on a 1x1 map.
    # VPU broadcast-multiply + lane reduction over C: (Nb,1,C)*(1,Cr,C) -> sum lanes.
    h = jnp.sum(pooled[:, None, :] * w1[None, :, :], axis=-1)        # (Nb, Cr)
    h = jnp.maximum(h + b1_ref[...], 0.0)                            # ReLU

    # Excite: Conv2d(Cr, C, 1) on a 1x1 map.
    # VPU broadcast-multiply + sublane reduction over Cr: (Nb,Cr,1)*(1,Cr,C) -> sum axis 1.
    g = jnp.sum(h[:, :, None] * w2[None, :, :], axis=1)              # (Nb, C)
    g = jax.nn.sigmoid(g + b2_ref[...])                              # gate in f32

    # Channel-wise rescale; cast the gate, not x.
    o_ref[...] = (x * g[:, :, None].astype(x.dtype)).astype(o_ref.dtype)


def _choose_nb(n, per_image_bytes, target_bytes=2 << 20):
    """Largest divisor of n whose block stays <= target; prefer >=2 grid steps."""
    divisors = [d for d in range(1, n + 1) if n % d == 0]
    fitting = [d for d in divisors if d * per_image_bytes <= target_bytes] or [1]
    two_step = [d for d in fitting if n // d >= 2]
    return max(two_step) if two_step else max(fitting)


def ca_layer(x, w1, b1, w2, b2):
    """CALayer forward.

    x : (N, C, H, W)
    w1: (Cr, C)   squeezed Conv2d(C, Cr, 1) weight
    b1: (Cr,)
    w2: (C, Cr)   squeezed Conv2d(Cr, C, 1) weight
    b2: (C,)
    """
    N, C, H, W = x.shape
    Cr = w1.shape[0]
    HW = H * W

    # Lane-dense layout: flatten spatial so the last dim is H*W.
    x2 = x.reshape(N, C, HW)
    w2t = w2.T                      # (Cr, C), lane-dense along C
    b1r = b1.reshape(1, Cr)
    b2r = b2.reshape(1, C)

    per_image_bytes = C * HW * x.dtype.itemsize
    Nb = _choose_nb(N, per_image_bytes)
    grid = (N // Nb,)
    block_bytes = Nb * per_image_bytes

    # ~2x (double-buffered) x (in block + out block) plus headroom; keep it
    # under v7x's 64 MiB physical VMEM while exploiting v5e/v6e headroom.
    vmem_limit = int(min(60 << 20, max(32 << 20, 4 * block_bytes + (4 << 20))))

    out2 = pl.pallas_call(
        ca_kernel,
        out_shape=jax.ShapeDtypeStruct((N, C, HW), x.dtype),
        grid=grid,
        in_specs=[
            pl.BlockSpec((Nb, C, HW), lambda n: (n, 0, 0)),
            pl.BlockSpec((Cr, C), lambda n: (0, 0)),
            pl.BlockSpec((1, Cr), lambda n: (0, 0)),
            pl.BlockSpec((Cr, C), lambda n: (0, 0)),
            pl.BlockSpec((1, C), lambda n: (0, 0)),
        ],
        out_specs=pl.BlockSpec((Nb, C, HW), lambda n: (n, 0, 0)),
        compiler_params=pltpu.CompilerParams(
            dimension_semantics=("parallel",),
            vmem_limit_bytes=vmem_limit,
        ),
    )(x2, w1, b1r, w2t, b2r)

    return out2.reshape(N, C, H, W)


def reference(x, w1, b1, w2, b2):
    # Pure-JAX reference of CALayer.forward
    pooled = jnp.mean(x, axis=(2, 3), keepdims=True)              # (N, C, 1, 1)
    y = jnp.einsum('oc,nchw->nohw', w1, pooled) + b1.reshape(1, -1, 1, 1)
    y = jnp.maximum(y, 0.0)
    y = jnp.einsum('oc,nchw->nohw', w2, y) + b2.reshape(1, -1, 1, 1)
    y = jax.nn.sigmoid(y)
    return x * y


if __name__ == "__main__":
    # Small shapes consistent with CALayer(channel=32, reduction=16)
    N, C, H, W = 2, 32, 16, 16
    reduction = 16
    Cr = C // reduction

    key = jax.random.PRNGKey(0)
    kx, k1, kb1, k2, kb2 = jax.random.split(key, 5)

    x = jax.random.normal(kx, (N, C, H, W), dtype=jnp.float32)
    # Conv2d weights are (out, in, 1, 1); keep the squeezed (out, in) form.
    w1 = jax.random.normal(k1, (Cr, C), dtype=jnp.float32) * 0.1
    b1 = jax.random.normal(kb1, (Cr,), dtype=jnp.float32) * 0.1
    w2 = jax.random.normal(k2, (C, Cr), dtype=jnp.float32) * 0.1
    b2 = jax.random.normal(kb2, (C,), dtype=jnp.float32) * 0.1

    out = ca_layer(x, w1, b1, w2, b2)
    out = jax.block_until_ready(out)

    ref = reference(x, w1, b1, w2, b2)
    assert out.shape == (N, C, H, W)
    assert jnp.allclose(out, ref, atol=1e-5, rtol=1e-5), "mismatch vs reference"

    print("KERNEL_OK")
</pallas_src>

<mosaic_0001>
module attributes {stable_mosaic.version = 11 : i64} {
  func.func @ca_kernel(%arg0: i32, %arg1: memref<1x32x256xf32, #tpu.memory_space<vmem>>, %arg2: memref<2x32xf32, #tpu.memory_space<vmem>>, %arg3: memref<1x2xf32, #tpu.memory_space<vmem>>, %arg4: memref<2x32xf32, #tpu.memory_space<vmem>>, %arg5: memref<1x32xf32, #tpu.memory_space<vmem>>, %arg6: memref<1x32x256xf32, #tpu.memory_space<vmem>>) attributes {dimension_semantics = [#tpu.dimension_semantics<parallel>], iteration_bounds = array<i64: 2>, scalar_prefetch = 0 : i64, scratch_operands = 0 : i64, tpu.core_type = #tpu.core_type<tc>, window_params = [{transform_indices = @transform_0, window_bounds = array<i64: 1, 32, 256>}, {pipeline_mode = #tpu.pipeline_mode<synchronous>, transform_indices = @transform_1, window_bounds = array<i64: 2, 32>}, {pipeline_mode = #tpu.pipeline_mode<synchronous>, transform_indices = @transform_2, window_bounds = array<i64: 1, 2>}, {pipeline_mode = #tpu.pipeline_mode<synchronous>, transform_indices = @transform_3, window_bounds = array<i64: 2, 32>}, {pipeline_mode = #tpu.pipeline_mode<synchronous>, transform_indices = @transform_4, window_bounds = array<i64: 1, 32>}, {transform_indices = @transform_5, window_bounds = array<i64: 1, 32, 256>}]} {
    %c0 = arith.constant 0 : index
    %c0_0 = arith.constant 0 : index
    %c0_1 = arith.constant 0 : index
    %0 = vector.load %arg1[%c0, %c0_0, %c0_1] : memref<1x32x256xf32, #tpu.memory_space<vmem>>, vector<1x32x256xf32>
    %cst = arith.constant dense<0.000000e+00> : vector<1x32xf32>
    %1 = vector.multi_reduction <add>, %0, %cst [2] : vector<1x32x256xf32> to vector<1x32xf32>
    %cst_2 = arith.constant 3.906250e-03 : f32
    %2 = vector.broadcast %cst_2 : f32 to vector<1x32xf32>
    %3 = arith.mulf %1, %2 : vector<1x32xf32>
    %c0_3 = arith.constant 0 : index
    %c0_4 = arith.constant 0 : index
    %4 = vector.load %arg2[%c0_3, %c0_4] : memref<2x32xf32, #tpu.memory_space<vmem>>, vector<2x32xf32>
    %c0_5 = arith.constant 0 : index
    %c0_6 = arith.constant 0 : index
    %5 = vector.load %arg4[%c0_5, %c0_6] : memref<2x32xf32, #tpu.memory_space<vmem>>, vector<2x32xf32>
    %6 = vector.shape_cast %3 : vector<1x32xf32> to vector<1x1x32xf32>
    %7 = vector.shape_cast %4 : vector<2x32xf32> to vector<1x2x32xf32>
    %8 = vector.broadcast %6 : vector<1x1x32xf32> to vector<1x2x32xf32>
    %9 = arith.mulf %8, %7 : vector<1x2x32xf32>
    %cst_7 = arith.constant dense<0.000000e+00> : vector<1x2xf32>
    %10 = vector.multi_reduction <add>, %9, %cst_7 [2] : vector<1x2x32xf32> to vector<1x2xf32>
    %c0_8 = arith.constant 0 : index
    %c0_9 = arith.constant 0 : index
    %11 = vector.load %arg3[%c0_8, %c0_9] : memref<1x2xf32, #tpu.memory_space<vmem>>, vector<1x2xf32>
    %12 = arith.addf %10, %11 : vector<1x2xf32>
    %cst_10 = arith.constant 0.000000e+00 : f32
    %13 = vector.broadcast %cst_10 : f32 to vector<1x2xf32>
    %14 = arith.maximumf %12, %13 : vector<1x2xf32>
    %15 = vector.shape_cast %14 : vector<1x2xf32> to vector<1x2x1xf32>
    %16 = vector.shape_cast %5 : vector<2x32xf32> to vector<1x2x32xf32>
    %17 = vector.broadcast %15 : vector<1x2x1xf32> to vector<1x2x32xf32>
    %18 = arith.mulf %17, %16 : vector<1x2x32xf32>
    %cst_11 = arith.constant dense<0.000000e+00> : vector<1x32xf32>
    %19 = vector.multi_reduction <add>, %18, %cst_11 [1] : vector<1x2x32xf32> to vector<1x32xf32>
    %c0_12 = arith.constant 0 : index
    %c0_13 = arith.constant 0 : index
    %20 = vector.load %arg5[%c0_12, %c0_13] : memref<1x32xf32, #tpu.memory_space<vmem>>, vector<1x32xf32>
    %21 = arith.addf %19, %20 : vector<1x32xf32>
    %22 = arith.negf %21 : vector<1x32xf32>
    %23 = math.exp %22 : vector<1x32xf32>
    %cst_14 = arith.constant 1.000000e+00 : f32
    %24 = vector.broadcast %cst_14 : f32 to vector<1x32xf32>
    %25 = arith.addf %24, %23 : vector<1x32xf32>
    %26 = arith.divf %24, %25 : vector<1x32xf32>
    %27 = vector.shape_cast %26 : vector<1x32xf32> to vector<1x32x1xf32>
    %28 = vector.broadcast %27 : vector<1x32x1xf32> to vector<1x32x256xf32>
    %29 = arith.mulf %0, %28 : vector<1x32x256xf32>
    %c0_15 = arith.constant 0 : index
    %c0_16 = arith.constant 0 : index
    %c0_17 = arith.constant 0 : index
    %30 = vector.load %arg6[%c0_15, %c0_16, %c0_17] : memref<1x32x256xf32, #tpu.memory_space<vmem>>, vector<1x32x256xf32>
    tpu.vector_store %arg6[%c0_15, %c0_16, %c0_17], %29 {strides = array<i32>} : memref<1x32x256xf32, #tpu.memory_space<vmem>>, vector<1x32x256xf32>,
    return
  }
  func.func @transform_0(%arg0: i32) -> (i32, i32, i32) {
    %c0_i32 = arith.constant 0 : i32
    %c0_i32_0 = arith.constant 0 : i32
    %c0_i32_1 = arith.constant 0 : i32
    return %arg0, %c0_i32, %c0_i32_0 : i32, i32, i32
  }
  func.func @transform_1(%arg0: i32) -> (i32, i32) {
    %c0_i32 = arith.constant 0 : i32
    %c0_i32_0 = arith.constant 0 : i32
    %c0_i32_1 = arith.constant 0 : i32
    return %c0_i32, %c0_i32_0 : i32, i32
  }
  func.func @transform_2(%arg0: i32) -> (i32, i32) {
    %c0_i32 = arith.constant 0 : i32
    %c0_i32_0 = arith.constant 0 : i32
    %c0_i32_1 = arith.constant 0 : i32
    return %c0_i32, %c0_i32_0 : i32, i32
  }
  func.func @transform_3(%arg0: i32) -> (i32, i32) {
    %c0_i32 = arith.constant 0 : i32
    %c0_i32_0 = arith.constant 0 : i32
    %c0_i32_1 = arith.constant 0 : i32
    return %c0_i32, %c0_i32_0 : i32, i32
  }
  func.func @transform_4(%arg0: i32) -> (i32, i32) {
    %c0_i32 = arith.constant 0 : i32
    %c0_i32_0 = arith.constant 0 : i32
    %c0_i32_1 = arith.constant 0 : i32
    return %c0_i32, %c0_i32_0 : i32, i32
  }
  func.func @transform_5(%arg0: i32) -> (i32, i32, i32) {
    %c0_i32 = arith.constant 0 : i32
    %c0_i32_0 = arith.constant 0 : i32
    %c0_i32_1 = arith.constant 0 : i32
    return %arg0, %c0_i32, %c0_i32_0 : i32, i32, i32
  }
}

</mosaic_0001>

<bundles_post_ra>
// kernel: tpu_custom_call.1
= control target key start
LH: loop header
LB: loop body
LE: loop exit
PB: predicated region body
PF: predicated region fallthrough
CT: control target
= control target key end

     0   :  { %s1145_s0 = inlined_call_operand.hbm [shape: f32[2,32,256], index: 0, kind: input, shape index: {}]   ;;  %s1146_s1 = inlined_call_operand.hbm [shape: f32[2,32], index: 1, kind: input, shape index: {}]   ;;  %s1147_s2 = inlined_call_operand.hbm [shape: f32[1,2], index: 2, kind: input, shape index: {}]   ;;  %s1148_s3 = inlined_call_operand.vmem [shape: f32[2,32], index: 3, kind: input, shape index: {}]   ;;  %s1149_s4 = inlined_call_operand.vmem [shape: f32[1,32], index: 4, kind: input, shape index: {}]   ;;  %s1150_s5 = inlined_call_operand.hbm [shape: f32[2,32,256], index: 5, kind: output, shape index: {}]  }
   0x1   :  { %1151 = sst [smem:[#allocation12_spill]] %s1146_s1 }
   0x2   :  { %1152 = sst [smem:[#allocation13_spill]] %s1147_s2 }
   0x3   :  { %10 = vsyncpa [#allocation3], 0 }
   0x4   :  { %12 = vsyncpa [#allocation3 + $0x1], 0 }
   0x5   :  { %13 = vsyncpa [#allocation6], 0 }
   0x6   :  { %14 = vsyncpa [#allocation4], 0 }
   0x7   :  { %16 = vsyncpa [#allocation4 + $0x1], 0  ;;  %s934_s18 = smov 0   ;;  %s936_s19 = smov 0  }
   0x8   :  { %s938_s20 = smov 0   ;;  %s940_s21 = smov 0  }
   0x9 LB: > { %s955_s22 = sadd.s32 4294967295, %s895_s21   ;;  %s623_s23 = sadd.s32 4294967294, %s895_s21   ;;  %s895_s21 = sphi %s940_s21, %s1165_s21   ;;  %s891_s20 = sphi %s938_s20, %s1164_s20   ;;  %s887_s19 = sphi %s936_s19, %s1163_s19   ;;  %s883_s18 = sphi %s934_s18, %s1162_s18  }
   0xa   : > { %s959_s24 = sadd.s32 1, %s895_s21   ;;  %s29_s25 = sadd.s32 1, %s891_s20 }
   0xb   : > { %s26_s26 = ssub.s32 %s895_s21, %s959_s24  ;;  %p36_p0 = scmp.ne.s32.totalorder %s891_s20, %s887_s19 }
   0xc   : > { %p27_p1 = scmp.eq.s32.totalorder %s26_s26, 0  ;;  %p37_p2 = scmp.eq.s32.totalorder %s895_s21, 0 }
   0xd   : > { %p42_p3 = scmp.ne.s32.totalorder %s887_s19, %s883_s18  ;;  %p43_p4 = scmp.eq.s32.totalorder %s955_s22, 0 }
   0xe   : > { %s971_s27 = scalar_select %p27_p1, %s891_s20, %s29_s25  }
   0xf   : > { %p973_p5 = por %p37_p2, %p36_p0  ;;  %p979_p6 = por %p43_p4, %p42_p3 }
  0x10   : > { %p150_p7 = scmp.eq.s32.totalorder %s955_s22, 1  ;;  %p156_p8 = scmp.eq.s32.totalorder %s623_s23, 1 }
  0x11   : > { %p624_p9 = scmp.ge.s32.totalorder %s895_s21, 1  ;;  %p163_p10 = scmp.lt.s32.totalorder %s895_s21, 3 }
  0x12   : > { %p986_p11 = por %p150_p7, %p36_p0  ;;  %p990_p12 = por %p156_p8, %p42_p3 }
  0x13   : > { %p994_p13 = pnand %p624_p9, %p163_p10  ;;  %s1158_s1 = sld [smem:[#allocation12_spill]] }
  0x14   : > { %s897_s11 = smov [#allocation5]   ;;  %p673_p3 = scmp.lt.s32.totalorder %s895_s21, 2 }
  0x15   : > { %p656_p1 = pneg %p994_p13  ;;  %s177_s12 = sshll.u32 %s897_s11, 4  ;;  %s178_s12 = int_to_ptr.vmem [resolvable:$true] %s177_s12 }
  0x16   : > { %s1159_s2 = sld [smem:[#allocation13_spill]]  ;;  %p1012_p7 = pnand %p673_p3, %p973_p5 }
  0x17   : > { %p657_p2 = pnand %p656_p1, %p43_p4  ;;  %s898_s17 = smov [#allocation7]  }
  0x18   : > { %s189_s23 = sshll.u32 %s898_s17, 4  ;;  %s206_s25 = sand.u32 1, %s891_s20   ;;  %s190_s23 = int_to_ptr.vmem [resolvable:$true] %s189_s23 }
  0x19   : > { %s175_s10 = sshll.u32 %s1158_s1, 4  ;;  %s628_s26 = sshll.u32 %s206_s25, 6  ;;  %s176_s10 = int_to_ptr.hbm [resolvable:$true] %s175_s10 }
  0x1a   : > { %659 = dma.hbm_to_vmem [thread:$0]  (!%p657_p2), %s176_s10, 32, %s178_s12, [#allocation6]  }
  0x1b   : > { %s642_s8 = sshll.u32 %s895_s21, 6  ;;  %s210_s14 = scalar_lea.vmem [#allocation2], %s628_s26 }
  0x1c   : > { %s187_s15 = sshll.u32 %s1159_s2, 4  ;;  %s215_s13 = scalar_lea.hbm %s1145_s0, %s642_s8  ;;  %s188_s15 = int_to_ptr.hbm [resolvable:$true] %s187_s15 }
  0x1d   : > { %662 = dma.hbm_to_vmem [thread:$0]  (!%p657_p2), %s188_s15, 16, %s190_s23, [#allocation6]  }
  0x1e   : > { %s218_s1 = sshll.u32 %s210_s14, 4  ;;  %s216_s10 = sshll.u32 %s215_s13, 4  ;;  %s219_s1 = int_to_ptr.vmem [resolvable:$true] %s218_s1  ;;  %s217_s10 = int_to_ptr.hbm [resolvable:$true] %s216_s10 }
  0x1f   : > { %s207_s28 = scalar_lea.sflag [#allocation3], %s206_s25  ;;  %s795_s12 = sshra.s32 %s217_s10, 4  ;;  %s796_s12 = int_to_ptr.hbm [resolvable:$true] %s795_s12 }
  0x20   : > { %s797_s2 = scalar_lea.hbm %s796_s12, 64  ;;  %p799_p8 = pneg %p1012_p7 }
  0x21   : > { %p798_p5 = scmp.ne.s32.totalorder %s796_s12, %s797_s2  ;;  %s802_s23 = scalar_lea.hbm %s1145_s0, 128 }
  0x22   : > { %p803_p1 = scmp.lt.s32.totalorder %s796_s12, %s1145_s0  ;;  %p804_p2 = scmp.lt.s32.totalorder %s802_s23, %s797_s2 }
  0x23   : > { %p800_p9 = pnand %p799_p8, %p798_p5 }
  0x24   : > { %p805_p3 = por %p804_p2, %p803_p1 }
  0x25   : > { %p801_p10 = pneg %p800_p9 }
  0x27   : > { %p806_p0 = pnand %p805_p3, %p801_p10 }
  0x29   : > { %809 = shalt.err (!%p806_p0)
}
  0x2a   : > { %s899_s25 = smov 256   ;;  %s900_s26 = smov 16  }
  0x2b   : > { %666 = dma.hbm_to_vmem [thread:$0]  (!%p1012_p7), %s217_s10, 1024, %s219_s1, %s207_s28, %s899_s25, %s899_s25, %s900_s26  }
  0x2c   : > { %230 = sbr.rel (%p994_p13) target bundleno = 761 (0x2f9), region = 40  ;;  %s1034_s11 = sand.u32 (!%p994_p13), 1, %s887_s19  }
  0x2d   : > { %s632_s13 = sshll.u32 (!%p994_p13), %s1034_s11, 6  ;;  %s233_s2 = scalar_lea.sflag (!%p994_p13), [#allocation3], %s1034_s11 }
  0x2e   : > { %s236_s14 = scalar_lea.vmem (!%p994_p13), [#allocation2], %s632_s13 }
  0x31   : > { %870 = dma.done.wait (%p979_p6), %s233_s2, 1024  }
  0x32   : > { %872 = vsyncadd (%p979_p6), %s233_s2, 4294966272 }
  0x33   : > { %874 = dma.done.wait (%p43_p4), [#allocation6], 48  }
  0x34   : > { %876 = vsyncadd (%p43_p4), [#allocation6], 4294967248  ;;  %v302_v0 = vlaneseq  ;;  %v1057_v3 = vld [vmem:[%s236_s14 + $0x20] sm:$0xff]  ;;  %v1059_v4 = vld [vmem:[%s236_s14 + $0x28] sm:$0xff]  ;;  %v901_v20 = vmov 0   ;;  %vm404_vm0 = vcmask 130112  }
  0x35   : > { %v1061_v5 = vld [vmem:[%s236_s14] sm:$0xff]  ;;  %v288_v6 = vadd.f32 %v1059_v4, %v1057_v3  ;;  %v1065_v7 = vld [vmem:[%s236_s14 + $0x8] sm:$0xff]  ;;  %v1069_v11 = vld [vmem:[%s236_s14 + $0x30] sm:$0xff]  ;;  %vm408_vm1 = vcmask 195712   ;;  %vm412_vm2 = vcmask 261312   ;;  %vm421_vm3 = vcmask 1041409  }
  0x36   : > { %v1049_v1 = vshrl.u32 %v302_v0, 7  ;;  %v298_v8 = vld [vmem:[#allocation5] sm:$0x3]  ;;  %v282_v9 = vadd.f32 %v1065_v7, %v1061_v5  ;;  %v1071_v12 = vld [vmem:[%s236_s14 + $0x38] sm:$0xff]  ;;  %v1073_v13 = vld [vmem:[%s236_s14 + $0x10] sm:$0xff]  ;;  %v400_v50 = vand.u32 127, %v302_v0 }
  0x37   : > { %v301_v10 = vperm.slane %v298_v8, 0  ;;  %289 = vadd.xlane.f32.xlu1 %v288_v6  ;;  %v1075_v14 = vld [vmem:[%s236_s14 + $0x18] sm:$0xff]  ;;  %v291_v15 = vadd.f32 %v1071_v12, %v1069_v11  ;;  %v326_v18 = vperm.slane %v298_v8, 1  ;;  %v730_v45 = vld [vmem:[#allocation7] ss:$0 sm:$0xff]  ;;  %vm424_vm4 = vcmask 254976  }
  0x38   : > { %716 = vset.pattern.permute.xlu2 %v1049_v1  ;;  %v1053_v2 = vadd.s32 8, %v1049_v1  ;;  %717 = vset.pattern.permute.xlu0 %v1049_v1  ;;  %v285_v16 = vadd.f32 %v1075_v14, %v1073_v13  ;;  %v1083_v17 = vadd.s32 16, %v1049_v1  ;;  %v1087_v19 = vadd.s32 24, %v1049_v1  ;;  %s273_s10 = scalar_lea.vmem [#allocation8], %s632_s13  ;;  %s643_s28 = sshll.u32 %s955_s22, 6 }
  0x39   : > { %283 = vadd.xlane.f32.xlu0 %v282_v9  ;;  %v402_v52 = vadd.s32 4294967288, %v400_v50  ;;  %v410_v55 = vadd.s32 4294967272, %v400_v50  ;;  %v406_v56 = vadd.s32 4294967280, %v400_v50  ;;  %s527_s17 = scalar_lea.hbm %s1150_s5, %s643_s28  ;;  %s528_s23 = sshll.u32 %s273_s10, 4  ;;  %s529_s23 = int_to_ptr.vmem [resolvable:$true] %s528_s23 }
  0x3a   : > { %719 = vset.pattern.permute.xlu1 %v1053_v2  ;;  %s530_s9 = sshll.u32 %s527_s17, 4  ;;  %s516_s8 = scalar_lea.sflag [#allocation4], %s1034_s11  ;;  %s531_s9 = int_to_ptr.hbm [resolvable:$true] %s530_s9 }
  0x3b   : > { %s839_s25 = sshra.s32 %s531_s9, 4  ;;  %s845_s2 = scalar_lea.hbm %s1150_s5, 128  ;;  %s840_s25 = int_to_ptr.hbm [resolvable:$true] %s839_s25 }
  0x3c   : > { %s841_s22 = scalar_lea.hbm %s840_s25, 64  ;;  %p846_p0 = scmp.lt.s32.totalorder %s840_s25, %s1150_s5 }
  0x3d   : > { %p842_p4 = scmp.ne.s32.totalorder %s840_s25, %s841_s22  ;;  %p847_p7 = scmp.lt.s32.totalorder %s845_s2, %s841_s22 }
  0x3f   : > { %292 = vadd.xlane.f32.xlu1 %v291_v15  ;;  %p843_p6 = pnand %p842_p4, %p986_p11  ;;  %p848_p5 = por %p847_p7, %p846_p0 }
  0x40   : > { %306 = vperm.xlu2 %716, %v301_v10  }
  0x41   : > { %286 = vadd.xlane.f32.xlu0 %v285_v16  ;;  %p844_p13 = pneg %p843_p6 }
  0x43   : > { %p849_p8 = pnand %p848_p5, %p844_p13 }
  0x48   : > { %718 = vset.pattern.permute.xlu2 %v1053_v2 }
  0x50   : > { %312 = vperm.xlu2 %718, %v301_v10  }
  0x55   : > { %331 = vperm.xlu0 %717, %v326_v18  }
  0x58   : > { %720 = vset.pattern.permute.xlu2 %v1083_v17  ;;  %337 = vperm.xlu1 %719, %v326_v18  }
  0x5d   : > { %724 = vset.pattern.permute.xlu0 %v901_v20 }
  0x60   : > { %318 = vperm.xlu2 %720, %v301_v10   ;;  %722 = vset.pattern.permute.xlu1 %v901_v20 }
  0x68   : > { %343 = vperm.xlu2 %720, %v326_v18  }
  0x70   : > { %721 = vset.pattern.permute.xlu2 %v1087_v19 }
  0x78   : > { %324 = vperm.xlu2 %721, %v301_v10  }
  0x80   : > { %349 = vperm.xlu2 %721, %v326_v18  }
  0x88   : > { %723 = vset.pattern.permute.xlu2 %v901_v20 }
  0x9a   : > { %v307_v21 = vpop.permute.xlu2 %306 }
  0xaa   : > { %v313_v25 = vpop.permute.xlu2 %312  ;;  %v290_v29 = vpop.xlane.xlu1 %289 }
  0xab   : > { %v296_v31 = vmul.f32 0.00390625, %v290_v29 }
  0xac   : > { %v284_v22 = vpop.xlane.xlu0 %283 }
  0xad   : > { %v294_v23 = vmul.f32 0.00390625, %v284_v22 }
  0xaf   : > { %v359_v24 = vmul.f32 %v307_v21, %v294_v23 }
  0xb1   : > { %376 = vperm.xlu1 %722, %v359_v24  }
  0xb2   : > { %v293_v33 = vpop.xlane.xlu1 %292 }
  0xb3   : > { %v297_v37 = vmul.f32 0.00390625, %v293_v33 }
  0xb4   : > { %v287_v26 = vpop.xlane.xlu0 %286 }
  0xb5   : > { %v295_v27 = vmul.f32 0.00390625, %v287_v26 }
  0xb7   : > { %v360_v28 = vmul.f32 %v313_v25, %v295_v27  ;;  %v299_v25 = vld [vmem:[%s1148_s3] sm:$0x3] }
  0xb9   : > { %379 = vperm.xlu2 %723, %v360_v28  }
  0xba   : > { %v319_v30 = vpop.permute.xlu2 %318 }
  0xbb   : > { %v361_v32 = vmul.f32 %v319_v30, %v296_v31 }
  0xc1   : > { %382 = vperm.xlu2 %723, %v361_v32  }
  0xc2   : > { %v344_v34 = vpop.permute.xlu2 %343 }
  0xc3   : > { %v365_v42 = vmul.f32 %v344_v34, %v296_v31  ;;  %v453_v34 = vld [vmem:[%s1149_s4] sm:$0x1] }
  0xc7   : > { %v332_v35 = vpop.permute.xlu0 %331 }
  0xc8   : > { %v363_v36 = vmul.f32 %v332_v35, %v294_v23 }
  0xca   : > { %388 = vperm.xlu1 %722, %v363_v36   ;;  %v338_v38 = vpop.permute.xlu1 %337 }
  0xcb   : > { %v364_v39 = vmul.f32 %v338_v38, %v295_v27 }
  0xcd   : > { %391 = vperm.xlu0 %724, %v364_v39  }
  0xd2   : > { %v325_v40 = vpop.permute.xlu2 %324  ;;  %394 = vperm.xlu1 %722, %v365_v42  }
  0xd3   : > { %v362_v41 = vmul.f32 %v325_v40, %v297_v37 }
  0xd5   : > { %385 = vperm.xlu2 %723, %v362_v41   ;;  %729 = vset.pattern.permute.xlu0 %v1087_v19 }
  0xda   : > { %v350_v43 = vpop.permute.xlu2 %349 }
  0xdb   : > { %v366_v44 = vmul.f32 %v350_v43, %v297_v37 }
  0xdd   : > { %725 = vset.pattern.permute.xlu2 %v1049_v1  ;;  %397 = vperm.xlu1 %722, %v366_v44  }
  0xe5   : > { %435 = vperm.xlu2 %725, %v730_v45  }
 0x113   : > { %v380_v47 = vpop.permute.xlu2 %379 }
 0x114   : > { %v403_v58 = vperm.slane %v380_v47, %v402_v52 }
 0x11b   : > { %v383_v49 = vpop.permute.xlu2 %382 }
 0x11c   : > { %v407_v1 = vperm.slane %v383_v49, %v406_v56 }
 0x123   : > { %v377_v46 = vpop.permute.xlu1 %376 }
 0x124   : > { %v401_v54 = vperm.slane %v377_v46, %v400_v50 }
 0x126   : > { %v405_v61 = vsel %vm404_vm0, %v403_v58, %v401_v54 }
 0x127   : > { %v409_v10 = vsel %vm408_vm1, %v407_v1, %v405_v61 }
 0x12f   : > { %v386_v57 = vpop.permute.xlu2 %385 }
 0x130   : > { %v411_v62 = vperm.slane %v386_v57, %v410_v55 }
 0x132   : > { %v413_v15 = vsel %vm412_vm2, %v411_v62, %v409_v10 }
 0x13c   : > { %v389_v48 = vpop.permute.xlu1 %388 }
 0x13d   : > { %v414_v63 = vperm.slane %v389_v48, %v400_v50 }
 0x13f   : > { %v392_v53 = vpop.permute.xlu0 %391  ;;  %v436_v21 = vpop.permute.xlu2 %435 }
 0x140   : > { %v415_v59 = vperm.slane %v392_v53, %v402_v52 }
 0x142   : > { %v416_v8 = vsel %vm404_vm0, %v415_v59, %v414_v63 }
 0x144   : > { %v395_v51 = vpop.permute.xlu1 %394 }
 0x145   : > { %v417_v60 = vperm.slane %v395_v51, %v406_v56 }
 0x147   : > { %v418_v9 = vsel %vm408_vm1, %v417_v60, %v416_v8 }
 0x14f   : > { %v398_v6 = vpop.permute.xlu1 %397 }
 0x150   : > { %v419_v0 = vperm.slane %v398_v6, %v410_v55 }
 0x152   : > { %v420_v16 = vsel %vm412_vm2, %v419_v0, %v418_v9 }
 0x153   : > { %v422_v18 = vsel %vm421_vm3, %v420_v16, %v413_v15 }
 0x154   : > { %v425_v20 = vsel %vm424_vm4, %v422_v18, 0.0 }
 0x155   : > { %426 = vadd.xlane.f32.xlu0 %v425_v20 }
 0x1c8   : > { %v427_v22 = vpop.xlane.xlu0 %426 }
 0x1c9   : > { %v438_v23 = vadd.f32 %v436_v21, %v427_v22 }
 0x1cb   : > { %v439_v24 = vmax.f32 %v438_v23, 0.0 }
 0x1cd   : > { %442 = vperm.xlu1 %722, %v439_v24  }
 0x1d5   : > { %726 = vset.pattern.permute.xlu1 %v1053_v2 }
 0x23f   : > { %v443_v26 = vpop.permute.xlu1 %442 }
 0x240   : > { %v445_v27 = vmul.f32 %v443_v26, %v299_v25 }
 0x242   : > { %v446_v28 = vsel %vm424_vm4, %v445_v27, 0.0 }
 0x243   : > { %v447_v29 = vrot.slane %v446_v28, 4 }
 0x245   : > { %v448_v30 = vadd.f32 %v447_v29, %v446_v28 }
 0x247   : > { %v449_v31 = vrot.slane %v448_v30, 2 }
 0x249   : > { %v450_v32 = vadd.f32 %v449_v31, %v448_v30 }
 0x24b   : > { %v451_v33 = vrot.slane %v450_v32, 1 }
 0x24d   : > { %v452_v35 = vadd.f32 %v451_v33, %v450_v32 }
 0x24f   : > { %v454_v36 = vadd.f32 %v453_v34, %v452_v35 }
 0x251   : > { %v636_v37 = vmul.f32 -1.442695, %v454_v36 }
 0x253   : > { %731 = vpow2.f32 %v636_v37 }
 0x259   : > { %v732_v2 = vpop.eup %731 }
 0x25a   : > { %v458_v38 = vadd.f32 1.0, %v732_v2 }
 0x25c   : > { %733 = vrcp.f32 %v458_v38  ;;  %v470_v42 = vand.u32 2147483648, %v458_v38  ;;  %v468_v44 = vand.u32 2147483647, %v458_v38  ;;  %vm464_vm6 = vweird.f32 %v458_v38 }
 0x25e   : > { %v471_v46 = vor.u32 1.1754944e-38, %v470_v42  ;;  %vm469_vm8 = vcmp.eq.f32.partialorder %v468_v44, 8.507059e+37 }
 0x262   : > { %v734_v39 = vpop.eup %733 }
 0x263   : > { %v460_v40 = vmul.f32 %v734_v39, %v458_v38  ;;  %vm465_vm5 = vweird.f32 %v734_v39 }
 0x264   : > { %vm466_vm7 = vmor %vm464_vm6, %vm465_vm5 }
 0x265   : > { %v461_v41 = vsub.f32 1.0, %v460_v40 }
 0x267   : > { %v462_v43 = vmul.f32 %v734_v39, %v461_v41 }
 0x269   : > { %v463_v45 = vadd.f32 %v734_v39, %v462_v43 }
 0x26b   : > { %v467_v47 = vsel %vm466_vm7, %v734_v39, %v463_v45 }
 0x26c   : > { %v472_v48 = vsel %vm469_vm8, %v471_v46, %v467_v47 }
 0x26d   : > { %v474_v49 = vperm.slane %v472_v48, 0 }
 0x26f   : > { %485 = vperm.xlu1 %726, %v474_v49   ;;  %479 = vperm.xlu2 %725, %v474_v49  }
 0x277   : > { %728 = vset.pattern.permute.xlu1 %v1087_v19  ;;  %727 = vset.pattern.permute.xlu2 %v1083_v17 }
 0x27f   : > { %497 = vperm.xlu1 %728, %v474_v49   ;;  %491 = vperm.xlu2 %727, %v474_v49  }
 0x2c9   : > { %v480_v50 = vpop.permute.xlu2 %479 }
 0x2ca   : > { %v499_v51 = vmul.f32 %v480_v50, %v1061_v5  ;;  %v500_v52 = vmul.f32 %v480_v50, %v1065_v7 }
 0x2cc   : > { %507 = vst [vmem:[%s273_s10] sm:$0xff] %v499_v51 }
 0x2cd   : > { %508 = vst [vmem:[%s273_s10 + $0x8] sm:$0xff] %v500_v52 }
 0x2d9   : > { %v492_v53 = vpop.permute.xlu2 %491 }
 0x2da   : > { %v503_v54 = vmul.f32 %v492_v53, %v1057_v3  ;;  %v504_v55 = vmul.f32 %v492_v53, %v1059_v4 }
 0x2dc   : > { %511 = vst [vmem:[%s273_s10 + $0x20] sm:$0xff] %v503_v54 }
 0x2dd   : > { %512 = vst [vmem:[%s273_s10 + $0x28] sm:$0xff] %v504_v55 }
 0x2e1   : > { %v486_v17 = vpop.permute.xlu1 %485 }
 0x2e2   : > { %v501_v19 = vmul.f32 %v486_v17, %v1073_v13  ;;  %v502_v56 = vmul.f32 %v486_v17, %v1075_v14 }
 0x2e4   : > { %509 = vst [vmem:[%s273_s10 + $0x10] sm:$0xff] %v501_v19 }
 0x2e5   : > { %510 = vst [vmem:[%s273_s10 + $0x18] sm:$0xff] %v502_v56 }
 0x2f1   : > { %v498_v3 = vpop.permute.xlu1 %497 }
 0x2f2   : > { %v505_v4 = vmul.f32 %v498_v3, %v1069_v11  ;;  %v506_v5 = vmul.f32 %v498_v3, %v1071_v12 }
 0x2f4   : > { %513 = vst [vmem:[%s273_s10 + $0x30] sm:$0xff] %v505_v4 }
 0x2f5   : > { %514 = vst [vmem:[%s273_s10 + $0x38] sm:$0xff] %v506_v5 }
 0x2f6   : > { %852 = shalt.err (!%p849_p8)
}
 0x2f7   : > { %s902_s11 = smov 256   ;;  %s903_s29 = smov 16  }
 0x2f8   : > { %654 = dma.vmem_to_hbm [thread:$0]  (%p986_p11), %s529_s23, 1024, %s531_s9, %s516_s8, %s902_s11, %s902_s11, %s903_s29  }
 0x2f9 PF: > { %s545_s7 = sand.u32 1, %s883_s18   ;;  %p1161_p9 = scmp.ge.s32.totalorder %s895_s21, 2 }
 0x2fa   : > { %s546_s16 = scalar_lea.sflag [#allocation4], %s545_s7 }
 0x2fb   : > { %p668_p10 = pnand %p1161_p9, %p990_p12 }
 0x2fd   : > { %p669_p1 = pneg %p668_p10 }
 0x2ff   : > { %878 = dma.done.wait (%p669_p1), %s546_s16, 1024  }
 0x300   : > { %880 = vsyncadd (%p669_p1), %s546_s16, 4294966272  ;;  %p19_p2 = scmp.ge.s32.totalorder %s959_s24, 4   ;;  %s1162_s18 = smov %s887_s19 }
 0x301   : > { %s1163_s19 = smov %s891_s20  ;;  %s1164_s20 = smov %s971_s27 }
 0x302   : > { %s1165_s21 = smov %s959_s24  ;;  %21 = sbr.rel (!%p19_p2) target bundleno = 9 (0x9), region = 93 }
 0x307   :  { %552 = vsyncpa [#allocation3], 1 }
 0x308   :  { %554 = vsyncpa [#allocation3 + $0x1], 1 }
 0x309   :  { %555 = vsyncpa [#allocation6], 1 }
 0x30a   :  { %556 = vsyncpa [#allocation4], 1 }
 0x30b   :  { %558 = vsyncpa [#allocation4 + $0x1], 1 }

</bundles_post_ra>
